<compile_context>
chip_gen: v7x
topology: tpu7x:2x2x1
jax: 0.10.0
libtpu: 0.0.40
codegen_flags: <defaults>
</compile_context>

<pallas_src>
import jax
import jax.numpy as jnp
from jax.experimental import pallas as pl
from jax.experimental.pallas import tpu as pltpu


def _make_kernel(HW, tHW):
    """Builds the kernel with HW / tHW baked in as Python constants."""
    needs_mask = (HW % tHW) != 0

    def kernel(x_ref, w_ref, b_ref, o_ref, acc_ref):
        # x_ref : (tB, C, tHW)  channels-second feature-map tile (streamed from HBM)
        # w_ref : (C, E)        weight.T pre-scaled by 1/HW (VMEM-resident, 1 buffer)
        # b_ref : (1, E)        linear bias (VMEM-resident, 1 buffer)
        # o_ref : (tB, E)       L2-normalized embedding tile
        # acc_ref: (tB, C) f32  pool-sum accumulator across the spatial grid axis
        j = pl.program_id(1)

        @pl.when(j == 0)
        def _():
            acc_ref[...] = jnp.zeros_like(acc_ref)

        x = x_ref[...]
        if needs_mask:
            # Zero out spatial columns past HW in the (partial) trailing block so padded
            # lanes never pollute the reduction.
            col = jax.lax.broadcasted_iota(jnp.int32, x.shape, 2)
            x = jnp.where(j * tHW + col < HW, x, jnp.zeros_like(x))

        # Sum over the lane (spatial) axis; accumulate in f32 regardless of input dtype.
        acc_ref[...] += jnp.sum(x, axis=-1, dtype=jnp.float32)

        @pl.when(j == pl.num_programs(1) - 1)
        def _():
            # pool_mean @ weight.T == pool_sum @ (weight.T / HW): the 1/HW factor is
            # already folded into w_ref, so acc is consumed directly by the MXU.
            y = jax.lax.dot_general(
                acc_ref[...], w_ref[...],
                dimension_numbers=(((1,), (0,)), ((), ())),
                preferred_element_type=jnp.float32)              # (tB, E)
            y = y + b_ref[...].astype(jnp.float32)
            # F.normalize(p=2, dim=1): y / max(||y||, 1e-12) == y * rsqrt(max(||y||^2, 1e-24))
            n2 = jnp.sum(y * y, axis=-1, keepdims=True)
            o_ref[...] = (y * jax.lax.rsqrt(jnp.maximum(n2, 1e-24))).astype(o_ref.dtype)

    return kernel


_MIN_GRID_STEPS = 8  # aim for >= ~8 batch steps when B allows (pipeline fill / 2 TCs on v7x)


def _choose_tiles(B, C, HW, itemsize, target_bytes=4 << 20):
    """Pick (tB, tHW) so one x block is ~target_bytes and always TPU-tiling legal.

    The minor (lane) block dim tHW is either the full HW or a multiple of 128; the batch
    tile is a multiple of 8 (or the full B) so the (tB, E) output block stays legal.
    """
    row_bytes = max(1, C * HW * itemsize)

    if 8 * row_bytes <= target_bytes and B > 8:
        # Batch-only tiling: biggest multiple-of-8 row count inside the byte budget, but
        # keep several grid steps when B is large so both v7x TensorCores get work.
        tB = (target_bytes // row_bytes) // 8 * 8
        steps_cap = max(8, (B // _MIN_GRID_STEPS) // 8 * 8)
        tB = max(8, min(tB, steps_cap, B))
        return min(tB, B), HW

    if B <= 8 and B * row_bytes <= target_bytes:
        # Tiny problem: whole batch in one (or a few) steps, full spatial extent.
        return B, HW

    # A handful of rows already exceeds the budget (large feature maps): keep tB small and
    # tile the spatial axis so one x block never blows past the VMEM budget.
    tB = min(B, 8)
    thw = (target_bytes // max(1, tB * C * itemsize)) // 128 * 128
    thw = max(128, thw)
    return tB, min(thw, HW)


def _single_buffered_spec(block_shape, index_map):
    """Grid-invariant operand: fetched once, so a single VMEM buffer suffices.

    Falls back to the default (double-buffered) BlockSpec on jax versions whose BlockSpec
    lacks the pipeline_mode kwarg.
    """
    try:
        return pl.BlockSpec(block_shape, index_map, pipeline_mode=pl.Buffered(1))
    except (TypeError, AttributeError):
        return pl.BlockSpec(block_shape, index_map)


def linear_embedding_forward(x_nchw, weight, bias):
    """x_nchw: (B, C, H, W); weight: (E, C) as nn.Linear; bias: (E,)."""
    B, C, H, W = x_nchw.shape
    E = weight.shape[0]
    HW = H * W

    # NCHW -> (B, C, HW) is a free, contiguous reshape (no extra HBM round trip); the
    # kernel pools over the minor HW axis directly.
    x3 = x_nchw.reshape(B, C, HW)

    # One-time wrapper-side weight prep: (E, C) -> (C, E) so the MXU consumes it with no
    # per-step transpose, with the 1/HW mean scale folded in.
    w_t = (jnp.transpose(weight) * (1.0 / HW)).astype(weight.dtype)   # (C, E)
    b2 = bias.reshape(1, E)

    tB, tHW = _choose_tiles(B, C, HW, x3.dtype.itemsize)
    grid = (pl.cdiv(B, tB), pl.cdiv(HW, tHW))

    cost = pl.CostEstimate(
        flops=B * HW * C + 2 * B * C * E + 4 * B * E,
        transcendentals=B,
        bytes_accessed=B * HW * C * x3.dtype.itemsize
        + C * E * w_t.dtype.itemsize
        + B * E * 4,
    )

    return pl.pallas_call(
        _make_kernel(HW, tHW),
        out_shape=jax.ShapeDtypeStruct((B, E), jnp.float32),
        grid=grid,
        in_specs=[
            # Streamed, double-buffered feature-map tile.
            pl.BlockSpec((tB, C, tHW), lambda i, j: (i, 0, j)),
            # Grid-invariant weight / bias: VMEM-resident, single-buffered.
            _single_buffered_spec((C, E), lambda i, j: (0, 0)),
            _single_buffered_spec((1, E), lambda i, j: (0, 0)),
        ],
        out_specs=pl.BlockSpec((tB, E), lambda i, j: (i, 0)),
        scratch_shapes=[pltpu.VMEM((tB, C), jnp.float32)],   # pool-sum accumulator
        compiler_params=pltpu.CompilerParams(
            dimension_semantics=("parallel", "arbitrary"),   # batch parallel, spatial reduce
            vmem_limit_bytes=32 * 1024 * 1024,               # headroom on v7x's 64 MiB VMEM
        ),
        cost_estimate=cost,
    )(x3, w_t, b2)


def _reference(x_nchw, weight, bias):
    B = x_nchw.shape[0]
    pool = jnp.mean(x_nchw, axis=(2, 3)).reshape(B, -1)
    y = pool @ weight.T + bias
    n = jnp.maximum(jnp.linalg.norm(y, axis=1, keepdims=True), 1e-12)
    return y / n


if __name__ == "__main__":
    # Small shapes consistent with the module: output_size=64, embedding_size=32
    B, C, H, W = 2, 64, 8, 8      # C == output_size (pooled feature width)
    E = 32                        # embedding_size

    key = jax.random.PRNGKey(0)
    kx, kw, kb = jax.random.split(key, 3)

    x = jax.random.normal(kx, (B, C, H, W), dtype=jnp.float32)

    # Deterministic nn.Linear-style init: U(-1/sqrt(in), 1/sqrt(in))
    bound = 1.0 / jnp.sqrt(jnp.float32(C))
    weight = jax.random.uniform(kw, (E, C), jnp.float32, -bound, bound)
    bias = jax.random.uniform(kb, (E,), jnp.float32, -bound, bound)

    out = jax.block_until_ready(linear_embedding_forward(x, weight, bias))
    ref = _reference(x, weight, bias)

    assert out.shape == (B, E)
    assert jnp.allclose(out, ref, atol=1e-5, rtol=1e-5)

    print("KERNEL_OK")
</pallas_src>

<mosaic_0001>
module attributes {stable_mosaic.version = 11 : i64} {
  func.func @kernel(%arg0: i32, %arg1: i32, %arg2: memref<2x64x64xf32, #tpu.memory_space<vmem>>, %arg3: memref<64x32xf32, #tpu.memory_space<vmem>>, %arg4: memref<1x32xf32, #tpu.memory_space<vmem>>, %arg5: memref<2x32xf32, #tpu.memory_space<vmem>>, %arg6: memref<2x64xf32, #tpu.memory_space<vmem>>) attributes {dimension_semantics = [#tpu.dimension_semantics<parallel>, #tpu.dimension_semantics<arbitrary>], iteration_bounds = array<i64: 1, 1>, scalar_prefetch = 0 : i64, scratch_operands = 1 : i64, tpu.core_type = #tpu.core_type<tc>, window_params = [{transform_indices = @transform_0, window_bounds = array<i64: 2, 64, 64>}, {pipeline_mode = #tpu.pipeline_mode<synchronous>, transform_indices = @transform_1, window_bounds = array<i64: 64, 32>}, {pipeline_mode = #tpu.pipeline_mode<synchronous>, transform_indices = @transform_2, window_bounds = array<i64: 1, 32>}, {transform_indices = @transform_3, window_bounds = array<i64: 2, 32>}]} {
    %c0_i32 = arith.constant 0 : i32
    %0 = arith.cmpi eq, %arg1, %c0_i32 : i32
    %1 = arith.extui %0 : i1 to i32
    %c0_i32_0 = arith.constant 0 : i32
    %2 = arith.cmpi ne, %1, %c0_i32_0 : i32
    scf.if %2 {
      %cst_9 = arith.constant 0.000000e+00 : f32
      %11 = vector.broadcast %cst_9 : f32 to vector<2x64xf32>
      %c0_10 = arith.constant 0 : index
      %c0_11 = arith.constant 0 : index
      %12 = vector.load %arg6[%c0_10, %c0_11] : memref<2x64xf32, #tpu.memory_space<vmem>>, vector<2x64xf32>
      tpu.vector_store %arg6[%c0_10, %c0_11], %11 {strides = array<i32>} : memref<2x64xf32, #tpu.memory_space<vmem>>, vector<2x64xf32>,
    } else {
    }
    %c0 = arith.constant 0 : index
    %c0_1 = arith.constant 0 : index
    %c0_2 = arith.constant 0 : index
    %3 = vector.load %arg2[%c0, %c0_1, %c0_2] : memref<2x64x64xf32, #tpu.memory_space<vmem>>, vector<2x64x64xf32>
    %c0_3 = arith.constant 0 : index
    %c0_4 = arith.constant 0 : index
    %4 = vector.load %arg6[%c0_3, %c0_4] : memref<2x64xf32, #tpu.memory_space<vmem>>, vector<2x64xf32>
    %cst = arith.constant dense<0.000000e+00> : vector<2x64xf32>
    %5 = vector.multi_reduction <add>, %3, %cst [2] : vector<2x64x64xf32> to vector<2x64xf32>
    %6 = arith.addf %4, %5 : vector<2x64xf32>
    %c0_5 = arith.constant 0 : index
    %c0_6 = arith.constant 0 : index
    %7 = vector.load %arg6[%c0_5, %c0_6] : memref<2x64xf32, #tpu.memory_space<vmem>>, vector<2x64xf32>
    tpu.vector_store %arg6[%c0_5, %c0_6], %6 {strides = array<i32>} : memref<2x64xf32, #tpu.memory_space<vmem>>, vector<2x64xf32>,
    %c0_i32_7 = arith.constant 0 : i32
    %8 = arith.cmpi eq, %arg1, %c0_i32_7 : i32
    %9 = arith.extui %8 : i1 to i32
    %c0_i32_8 = arith.constant 0 : i32
    %10 = arith.cmpi ne, %9, %c0_i32_8 : i32
    scf.if %10 {
      %c0_9 = arith.constant 0 : index
      %c0_10 = arith.constant 0 : index
      %11 = vector.load %arg6[%c0_9, %c0_10] : memref<2x64xf32, #tpu.memory_space<vmem>>, vector<2x64xf32>
      %c0_11 = arith.constant 0 : index
      %c0_12 = arith.constant 0 : index
      %12 = vector.load %arg3[%c0_11, %c0_12] : memref<64x32xf32, #tpu.memory_space<vmem>>, vector<64x32xf32>
      %cst_13 = arith.constant dense<0.000000e+00> : vector<2x32xf32>
      %13 = tpu.matmul %11, %12, %cst_13 {dimension_numbers = #tpu.dot_dimension_numbers<[1], [0], [0], [1], [0, 0, 1, 1], [], []>} : vector<2x64xf32>, vector<64x32xf32>, vector<2x32xf32> -> vector<2x32xf32>
      %c0_14 = arith.constant 0 : index
      %c0_15 = arith.constant 0 : index
      %14 = vector.load %arg4[%c0_14, %c0_15] : memref<1x32xf32, #tpu.memory_space<vmem>>, vector<1x32xf32>
      %15 = vector.broadcast %14 : vector<1x32xf32> to vector<2x32xf32>
      %16 = arith.addf %13, %15 : vector<2x32xf32>
      %17 = arith.mulf %16, %16 : vector<2x32xf32>
      %cst_16 = arith.constant dense<0.000000e+00> : vector<2xf32>
      %18 = vector.multi_reduction <add>, %17, %cst_16 [1] : vector<2x32xf32> to vector<2xf32>
      %19 = vector.shape_cast %18 : vector<2xf32> to vector<2x1xf32>
      %cst_17 = arith.constant 1.000000e-24 : f32
      %20 = vector.broadcast %cst_17 : f32 to vector<2x1xf32>
      %21 = arith.maximumf %19, %20 : vector<2x1xf32>
      %22 = math.rsqrt %21 : vector<2x1xf32>
      %23 = vector.broadcast %22 : vector<2x1xf32> to vector<2x32xf32>
      %24 = arith.mulf %16, %23 : vector<2x32xf32>
      %c0_18 = arith.constant 0 : index
      %c0_19 = arith.constant 0 : index
      %25 = vector.load %arg5[%c0_18, %c0_19] : memref<2x32xf32, #tpu.memory_space<vmem>>, vector<2x32xf32>
      tpu.vector_store %arg5[%c0_18, %c0_19], %24 {strides = array<i32>} : memref<2x32xf32, #tpu.memory_space<vmem>>, vector<2x32xf32>,
    } else {
    }
    return
  }
  func.func @transform_0(%arg0: i32, %arg1: i32) -> (i32, i32, i32) {
    %c0_i32 = arith.constant 0 : i32
    %c0_i32_0 = arith.constant 0 : i32
    return %arg0, %c0_i32, %arg1 : i32, i32, i32
  }
  func.func @transform_1(%arg0: i32, %arg1: i32) -> (i32, i32) {
    %c0_i32 = arith.constant 0 : i32
    %c0_i32_0 = arith.constant 0 : i32
    %c0_i32_1 = arith.constant 0 : i32
    return %c0_i32, %c0_i32_0 : i32, i32
  }
  func.func @transform_2(%arg0: i32, %arg1: i32) -> (i32, i32) {
    %c0_i32 = arith.constant 0 : i32
    %c0_i32_0 = arith.constant 0 : i32
    %c0_i32_1 = arith.constant 0 : i32
    return %c0_i32, %c0_i32_0 : i32, i32
  }
  func.func @transform_3(%arg0: i32, %arg1: i32) -> (i32, i32) {
    %c0_i32 = arith.constant 0 : i32
    %c0_i32_0 = arith.constant 0 : i32
    return %arg0, %c0_i32 : i32, i32
  }
}

</mosaic_0001>

<bundles_post_ra>
// kernel: tpu_custom_call.1
= control target key start
LH: loop header
LB: loop body
LE: loop exit
PB: predicated region body
PF: predicated region fallthrough
CT: control target
= control target key end

     0   :  { %8 = vsyncpa [#allocation4], 0  ;;  %s539_s0 = inlined_call_operand.hbm [shape: f32[2,64,64], index: 0, kind: input, shape index: {}]   ;;  %s540_s1 = inlined_call_operand.vmem [shape: f32[64,32], index: 1, kind: input, shape index: {}]   ;;  %s541_s2 = inlined_call_operand.vmem [shape: f32[1,32], index: 2, kind: input, shape index: {}]   ;;  %s542_s3 = inlined_call_operand.hbm [shape: f32[2,32], index: 3, kind: output, shape index: {}]  }
   0x1   :  { %9 = vsyncpa [#allocation5], 0  ;;  %s432_s12 = smov [#allocation3]   ;;  %s384_s16 = scalar_lea.hbm %s539_s0, 2048 }
   0x2   :  { %s15_s13 = sshll.u32 %s432_s12, 4  ;;  %p385_p0 = scmp.ne.s32.totalorder %s539_s0, %s384_s16  ;;  %s16_s13 = int_to_ptr.vmem [resolvable:$true] %s15_s13 }
   0x3   :  { %p388_p1 = scmp.lt.u32.totalorder %s384_s16, %s539_s0 }
   0x5   :  { %p390_p2 = pnand %p388_p1, %p385_p0 }
   0x7   :  { %393 = shalt.err (!%p390_p2)
}
   0x8   :  { %s394_s21 = scalar_lea.vmem %s16_s13, 2048  ;;  %p399_p4 = scmp.lt.s32.totalorder %s16_s13, %s16_s13 }
   0x9   :  { %p395_p3 = scmp.ne.s32.totalorder %s16_s13, %s394_s21  ;;  %p400_p5 = scmp.lt.s32.totalorder %s394_s21, %s394_s21 }
   0xb   :  { %p401_p6 = por %p400_p5, %p399_p4 }
   0xd   :  { %p402_p7 = pnand %p401_p6, %p395_p3 }
   0xf   :  { %405 = shalt.err (!%p402_p7)
}
  0x10   :  { %s433_s22 = smov 128   ;;  %s434_s23 = smov 8  }
  0x11   :  { %21 = dma.hbm_to_vmem [thread:$0]  %s539_s0, 2048, %s16_s13, [#allocation4], %s433_s22, %s433_s22, %s434_s23  }
  0x12   :  { %428 = dma.done.wait [#allocation4], 2048  }
  0x13   :  { %429 = vsyncadd [#allocation4], 4294965248  ;;  %vm52_vm0 = vcmask 523264   ;;  %v43_v0 = vld [vmem:[#allocation3 + $0x40] sm:$0xff]  ;;  %v44_v2 = vld [vmem:[#allocation3 + $0x48] sm:$0xff]  ;;  %vm33_vm1 = vcmask 517120   ;;  %v117_v50 = vlaneseq }
  0x14   :  { %v35_v1 = vld [vmem:[#allocation3] sm:$0xff]  ;;  %v77_v3 = vsel %vm52_vm0, %v43_v0, 0.0  ;;  %v36_v5 = vld [vmem:[#allocation3 + $0x8] sm:$0xff]  ;;  %v80_v6 = vsel %vm52_vm0, %v44_v2, 0.0  ;;  %v45_v8 = vld [vmem:[#allocation3 + $0x50] sm:$0xff]  ;;  %v435_v34 = vmov 0.0  }
  0x15   :  { %v53_v4 = vsel %vm52_vm0, %v35_v1, 0.0  ;;  %78 = vadd.xlane.f32.xlu1 %v77_v3  ;;  %v56_v7 = vsel %vm52_vm0, %v36_v5, 0.0  ;;  %v37_v9 = vld [vmem:[#allocation3 + $0x10] sm:$0xff]  ;;  %v83_v10 = vsel %vm52_vm0, %v45_v8, 0.0  ;;  %v46_v12 = vld [vmem:[#allocation3 + $0x58] sm:$0xff]  ;;  %v47_v16 = vld [vmem:[#allocation3 + $0x60] sm:$0xff] }
  0x16   :  { %54 = vadd.xlane.f32.xlu0 %v53_v4  ;;  %v59_v11 = vsel %vm52_vm0, %v37_v9, 0.0  ;;  %v38_v13 = vld [vmem:[#allocation3 + $0x18] sm:$0xff]  ;;  %v86_v14 = vsel %vm52_vm0, %v46_v12, 0.0  ;;  %v39_v17 = vld [vmem:[#allocation3 + $0x20] sm:$0xff]  ;;  %v89_v18 = vsel %vm52_vm0, %v47_v16, 0.0  ;;  %v48_v20 = vld [vmem:[#allocation3 + $0x68] sm:$0xff] }
  0x17   :  { %v62_v15 = vsel %vm52_vm0, %v38_v13, 0.0  ;;  %v65_v19 = vsel %vm52_vm0, %v39_v17, 0.0  ;;  %v40_v21 = vld [vmem:[#allocation3 + $0x28] sm:$0xff]  ;;  %v92_v22 = vsel %vm52_vm0, %v48_v20, 0.0  ;;  %v49_v24 = vld [vmem:[#allocation3 + $0x70] sm:$0xff]  ;;  %v50_v28 = vld [vmem:[#allocation3 + $0x78] sm:$0xff] }
  0x18   :  { %v68_v23 = vsel %vm52_vm0, %v40_v21, 0.0  ;;  %v41_v25 = vld [vmem:[#allocation3 + $0x30] sm:$0xff]  ;;  %v95_v26 = vsel %vm52_vm0, %v49_v24, 0.0  ;;  %v42_v29 = vld [vmem:[#allocation3 + $0x38] sm:$0xff]  ;;  %v98_v30 = vsel %vm52_vm0, %v50_v28, 0.0  ;;  %v222_v33 = vld [vmem:[%s540_s1 + $0x8] sm:$0xff] }
  0x19   :  { %81 = vadd.xlane.f32.xlu1 %v80_v6  ;;  %v71_v27 = vsel %vm52_vm0, %v41_v25, 0.0  ;;  %v74_v31 = vsel %vm52_vm0, %v42_v29, 0.0  ;;  %v221_v32 = vld [vmem:[%s540_s1] sm:$0xff]  ;;  %34 = vst.msk [vmem:[#allocation2] sm:$0x3] %vm33_vm1, %v435_v34  ;;  %v436_v36 = vmov 0.0|0.0  }
  0x1a   :  { %57 = vadd.xlane.f32.xlu0 %v56_v7  ;;  %v364_v35 = vpack.c.bf16 %v222_v33, %v221_v32  ;;  %363 = vmatprep.subr.bf16.mxu0 %v436_v36  ;;  %v223_v37 = vld [vmem:[%s540_s1 + $0x10] sm:$0xff]  ;;  %v224_v38 = vld [vmem:[%s540_s1 + $0x18] sm:$0xff]  ;;  %v225_v40 = vld [vmem:[%s540_s1 + $0x20] sm:$0xff]  ;;  %vm437_vm2 = vmmov 0   ;;  %v118_v53 = vand.u32 127, %v117_v50  ;;  %v120_v58 = vshrl.u32 %v117_v50, 7 }
  0x1b   :  { %v367_v39 = vpack.c.bf16 %v224_v38, %v223_v37  ;;  %v226_v41 = vld [vmem:[%s540_s1 + $0x28] sm:$0xff]  ;;  %v227_v43 = vld [vmem:[%s540_s1 + $0x30] sm:$0xff]  ;;  %v228_v44 = vld [vmem:[%s540_s1 + $0x38] sm:$0xff]  ;;  %360 = vmatprep.mubr.msk.f32.mxu0 %vm437_vm2, %v435_v34  ;;  %vm128_vm3 = vcmask 130112   ;;  %vm135_vm4 = vcmask 195712   ;;  %vm142_vm5 = vcmask 261312  }
  0x1c   :  { %365 = vmatpush3.bf16.msra.mxu0 %v364_v35  ;;  %v370_v42 = vpack.c.bf16 %v226_v41, %v225_v40  ;;  %v373_v45 = vpack.c.bf16 %v228_v44, %v227_v43  ;;  %v123_v56 = vadd.s32 4294967288, %v118_v53  ;;  %v130_v57 = vadd.s32 4294967280, %v118_v53  ;;  %v333_v50 = vld [vmem:[%s541_s2] ss:$0 sm:$0xff]  ;;  %s438_s15 = smov [#allocation6]  }
  0x1d   :  { %84 = vadd.xlane.f32.xlu1 %v83_v10  ;;  %366 = vmatprep.subr.bf16.mxu0 %v436_v36  ;;  %v137_v59 = vadd.s32 4294967272, %v118_v53  ;;  %v144_v60 = vadd.s32 4294967264, %v118_v53  ;;  %v151_v0 = vadd.s32 4294967256, %v118_v53  ;;  %v158_v2 = vadd.s32 4294967248, %v118_v53  ;;  %s324_s16 = sshll.u32 %s438_s15, 4  ;;  %s325_s16 = int_to_ptr.vmem [resolvable:$true] %s324_s16 }
  0x1e   :  { %60 = vadd.xlane.f32.xlu0 %v59_v11  ;;  %v126_v63 = vsub.s32 %v123_v56, %v120_v58  ;;  %v133_v1 = vsub.s32 %v130_v57, %v120_v58  ;;  %v121_v3 = vsub.s32 %v118_v53, %v120_v58  ;;  %v165_v8 = vadd.s32 4294967240, %v118_v53  ;;  %s406_s17 = scalar_lea.vmem %s325_s16, 32  ;;  %p411_p9 = scmp.lt.s32.totalorder %s325_s16, %s325_s16 }
  0x1f   :  { %v140_v4 = vsub.s32 %v137_v59, %v120_v58  ;;  %v147_v5 = vsub.s32 %v144_v60, %v120_v58  ;;  %v154_v11 = vsub.s32 %v151_v0, %v120_v58  ;;  %vm149_vm6 = vcmask 326912   ;;  %p407_p8 = scmp.ne.s32.totalorder %s325_s16, %s406_s17  ;;  %p412_p10 = scmp.lt.s32.totalorder %s406_s17, %s406_s17 }
  0x20   :  { %368 = vmatpush3.bf16.msra.mxu0 %v367_v39  ;;  %vm156_vm7 = vcmask 392512   ;;  %vm163_vm8 = vcmask 458112   ;;  %vm170_vm9 = vcmask 523712   ;;  %vm211_vm10 = vcmask 1041409   ;;  %v51_v44 = vld [vmem:[#allocation2] sm:$0x3] }
  0x21   :  { %87 = vadd.xlane.f32.xlu1 %v86_v14  ;;  %369 = vmatprep.subr.bf16.mxu0 %v436_v36  ;;  %v161_v14 = vsub.s32 %v158_v2, %v120_v58  ;;  %vm310_vm11 = vcmask 254976   ;;  %p413_p11 = por %p412_p10, %p411_p9 }
  0x22   :  { %63 = vadd.xlane.f32.xlu0 %v62_v15 }
  0x23   :  { %p414_p12 = pnand %p413_p11, %p407_p8 }
  0x24   :  { %371 = vmatpush3.bf16.msra.mxu0 %v370_v42 }
  0x25   :  { %90 = vadd.xlane.f32.xlu1 %v89_v18  ;;  %372 = vmatprep.subr.bf16.mxu0 %v436_v36 }
  0x26   :  { %66 = vadd.xlane.f32.xlu0 %v65_v19 }
  0x28   :  { %374 = vmatpush3.bf16.msra.mxu0 %v373_v45 }
  0x29   :  { %93 = vadd.xlane.f32.xlu1 %v92_v22 }
  0x2a   :  { %69 = vadd.xlane.f32.xlu0 %v68_v23  ;;  %v168_v23 = vsub.s32 %v165_v8, %v120_v58 }
  0x2d   :  { %96 = vadd.xlane.f32.xlu1 %v95_v26 }
  0x2e   :  { %72 = vadd.xlane.f32.xlu0 %v71_v27 }
  0x31   :  { %99 = vadd.xlane.f32.xlu1 %v98_v30 }
  0x32   :  { %75 = vadd.xlane.f32.xlu0 %v74_v31 }
  0xa2   :  { %v79_v46 = vpop.xlane.xlu1 %78 }
  0xa3   :  { %v55_v47 = vpop.xlane.xlu0 %54  ;;  %v175_v15 = vrot.slane %v79_v46, %v121_v3 }
  0xa4   :  { %v122_v16 = vrot.slane %v55_v47, %v121_v3 }
  0xa6   :  { %v82_v48 = vpop.xlane.xlu1 %81 }
  0xa7   :  { %v58_v49 = vpop.xlane.xlu0 %57  ;;  %v179_v9 = vrot.slane %v82_v48, %v126_v63 }
  0xa8   :  { %v127_v10 = vrot.slane %v58_v49, %v126_v63 }
  0xa9   :  { %v180_v24 = vsel %vm128_vm3, %v179_v9, %v175_v15 }
  0xaa   :  { %v85_v51 = vpop.xlane.xlu1 %84  ;;  %v129_v25 = vsel %vm128_vm3, %v127_v10, %v122_v16 }
  0xab   :  { %v61_v52 = vpop.xlane.xlu0 %60  ;;  %v184_v12 = vrot.slane %v85_v51, %v133_v1 }
  0xac   :  { %v134_v13 = vrot.slane %v61_v52, %v133_v1 }
  0xad   :  { %v185_v28 = vsel %vm135_vm4, %v184_v12, %v180_v24 }
  0xae   :  { %v88_v54 = vpop.xlane.xlu1 %87  ;;  %v136_v29 = vsel %vm135_vm4, %v134_v13, %v129_v25 }
  0xaf   :  { %v64_v55 = vpop.xlane.xlu0 %63  ;;  %v189_v17 = vrot.slane %v88_v54, %v140_v4 }
  0xb0   :  { %v141_v18 = vrot.slane %v64_v55, %v140_v4 }
  0xb1   :  { %v190_v32 = vsel %vm142_vm5, %v189_v17, %v185_v28 }
  0xb2   :  { %v91_v61 = vpop.xlane.xlu1 %90  ;;  %v143_v33 = vsel %vm142_vm5, %v141_v18, %v136_v29 }
  0xb3   :  { %v67_v62 = vpop.xlane.xlu0 %66  ;;  %v194_v19 = vrot.slane %v91_v61, %v147_v5 }
  0xb4   :  { %v148_v20 = vrot.slane %v67_v62, %v147_v5 }
  0xb5   :  { %v195_v34 = vsel %vm149_vm6, %v194_v19, %v190_v32 }
  0xb6   :  { %v94_v6 = vpop.xlane.xlu1 %93  ;;  %v150_v35 = vsel %vm149_vm6, %v148_v20, %v143_v33 }
  0xb7   :  { %v70_v7 = vpop.xlane.xlu0 %69  ;;  %v199_v26 = vrot.slane %v94_v6, %v154_v11 }
  0xb8   :  { %v155_v27 = vrot.slane %v70_v7, %v154_v11 }
  0xb9   :  { %v200_v38 = vsel %vm156_vm7, %v199_v26, %v195_v34 }
  0xba   :  { %v97_v21 = vpop.xlane.xlu1 %96  ;;  %v157_v39 = vsel %vm156_vm7, %v155_v27, %v150_v35 }
  0xbb   :  { %v73_v22 = vpop.xlane.xlu0 %72  ;;  %v204_v30 = vrot.slane %v97_v21, %v161_v14 }
  0xbc   :  { %v162_v31 = vrot.slane %v73_v22, %v161_v14 }
  0xbd   :  { %v205_v42 = vsel %vm163_vm8, %v204_v30, %v200_v38 }
  0xbe   :  { %v100_v36 = vpop.xlane.xlu1 %99  ;;  %v164_v43 = vsel %vm163_vm8, %v162_v31, %v157_v39 }
  0xbf   :  { %v76_v37 = vpop.xlane.xlu0 %75  ;;  %v209_v40 = vrot.slane %v100_v36, %v168_v23 }
  0xc0   :  { %v169_v41 = vrot.slane %v76_v37, %v168_v23 }
  0xc1   :  { %v210_v45 = vsel %vm170_vm9, %v209_v40, %v205_v42 }
  0xc2   :  { %v171_v46 = vsel %vm170_vm9, %v169_v41, %v164_v43 }
  0xc3   :  { %v212_v47 = vsel %vm211_vm10, %v210_v45, %v171_v46 }
  0xc4   :  { %v214_v48 = vadd.f32 %v212_v47, %v51_v44 }
  0xc6   :  { %216 = vst.msk [vmem:[#allocation2] sm:$0x3] %vm33_vm1, %v214_v48 }
  0xcd   :  { %v220_v49 = vld [vmem:[#allocation2] sm:$0x3] }
  0xce   :  { %361 = vmatmul.mubr.msk.f32.vlgmr.msra.gmra.mrb[0].mxu0 %vm52_vm0, %v220_v49 }
 0x1a1   :  { %v305_v51 = vpop.f32.mrb[0].mxu0 }
 0x1a2   :  { %v306_v52 = vadd.f32 %v333_v50, %v305_v51  ;;  %v362_v53 = vpop.f32.mrb[1].mxu0 }
 0x1a4   :  { %v309_v54 = vmul.f32 %v306_v52, %v306_v52 }
 0x1a6   :  { %v311_v55 = vsel %vm310_vm11, %v309_v54, 0.0 }
 0x1a7   :  { %312 = vadd.xlane.f32.xlu0 %v311_v55 }
 0x234   :  { %v313_v56 = vpop.xlane.xlu0 %312 }
 0x235   :  { %v314_v57 = vmax.f32 %v313_v56, 1e-24 }
 0x237   :  { %382 = vrsqrt.f32 %v314_v57 }
 0x241   :  { %v383_v58 = vpop.eup %382 }
 0x242   :  { %v316_v59 = vmul.f32 %v383_v58, %v306_v52 }
 0x244   :  { %317 = vst.msk [vmem:[#allocation6] sm:$0x3] %vm310_vm11, %v316_v59 }
 0x245   :  { %417 = shalt.err (!%p414_p12)
}
 0x246   :  { %s418_s19 = scalar_lea.hbm %s542_s3, 32 }
 0x247   :  { %p419_p13 = scmp.ne.s32.totalorder %s542_s3, %s418_s19  ;;  %p422_p0 = scmp.lt.u32.totalorder %s418_s19, %s542_s3 }
 0x249   :  { %p424_p1 = pnand %p422_p0, %p419_p13 }
 0x24b   :  { %427 = shalt.err (!%p424_p1)
}
 0x24c   :  { %327 = dma.vmem_to_hbm [thread:$0]  %s325_s16, 32, %s542_s3, [#allocation5]  }
 0x24d   :  { %430 = dma.done.wait [#allocation5], 32  }
 0x24e   :  { %431 = vsyncadd [#allocation5], 4294967264 }
 0x24f   :  { %331 = vsyncpa [#allocation4], 1 }
 0x250   :  { %332 = vsyncpa [#allocation5], 1 }

</bundles_post_ra>
